<compile_context>
chip_gen: v7x
topology: tpu7x:2x2x1
jax: 0.10.0
libtpu: 0.0.40
codegen_flags: <defaults>
</compile_context>

<pallas_src>
import jax
import jax.numpy as jnp
from jax.experimental import pallas as pl
from jax.experimental.pallas import tpu as pltpu

LANE = 128      # lanes per vreg (fast axis)
SUBLANE = 8     # sublanes per vreg (slow axis)


def _round_up(a, m):
    return ((a + m - 1) // m) * m


def mlp_kernel(x_ref, w1_ref, b1_ref, w2_ref, b2_ref, o_ref):
    """One batch tile of Linear(2->8) -> ReLU -> Linear(8->1).

    x_ref : (2, TBS, 128) VMEM  -- feature-major, batch packed (sublane, lane)-dense
    w1_ref: (16,) SMEM  -- row-major flatten of the torch (8, 2) weight
    b1_ref: (8,)  SMEM
    w2_ref: (8,)  SMEM  -- flatten of the torch (1, 8) weight
    b2_ref: (1,)  SMEM
    o_ref : (TBS, 128) VMEM -- lane-dense output slab
    """
    x0 = x_ref[0]                       # (TBS, 128)
    x1 = x_ref[1]                       # (TBS, 128)
    acc = jnp.zeros_like(x0)
    # Fully unrolled VPU FMAs — no MXU for these degenerate contractions.
    for j in range(8):
        h = w1_ref[2 * j] * x0 + w1_ref[2 * j + 1] * x1 + b1_ref[j]
        h = jnp.maximum(h, 0.0)         # ReLU
        acc = acc + w2_ref[j] * h
    o_ref[...] = acc + b2_ref[0]


def my_neural_net(x, w1, b1, w2, b2, *, block_rows=1024):
    """x: (B, 2) f32 -> (B, 1) f32.

    Parameters are in PyTorch nn.Linear layout:
      w1: (8, 2), b1: (8,), w2: (1, 8), b2: (1,)
    """
    B = x.shape[0]

    # Number of 128-lane batch rows, rounded up to the 8-sublane granule.
    n_rows = _round_up(pl.cdiv(B, LANE), SUBLANE)
    if n_rows <= block_rows:
        tbs = n_rows                       # single grid step
    else:
        tbs = block_rows                   # ~1 MiB x-block per step at 1024
        n_rows = _round_up(n_rows, tbs)
    Bp = n_rows * LANE
    grid = (n_rows // tbs,)

    # Feature-major, lane-dense layout: x[b, f] -> xf[f, b // 128, b % 128].
    # (Layout plumbing on the host side; padding rows are zeros and are
    #  sliced off after the call, so no masking is needed in the kernel.)
    xf = jnp.zeros((Bp, 2), jnp.float32).at[:B].set(x.astype(jnp.float32))
    xf = xf.T.reshape(2, n_rows, LANE)

    # Flatten the <100-float parameter set for SMEM residency.
    w1f = w1.reshape(-1).astype(jnp.float32)   # (16,), w1f[2j+k] = w1[j, k]
    b1f = b1.reshape(-1).astype(jnp.float32)   # (8,)
    w2f = w2.reshape(-1).astype(jnp.float32)   # (8,),  w2f[j] = w2[0, j]
    b2f = b2.reshape(-1).astype(jnp.float32)   # (1,)

    smem = pl.BlockSpec(memory_space=pltpu.MemorySpace.SMEM)

    out = pl.pallas_call(
        mlp_kernel,
        out_shape=jax.ShapeDtypeStruct((n_rows, LANE), jnp.float32),
        grid=grid,
        in_specs=[
            pl.BlockSpec((2, tbs, LANE), lambda i: (0, i, 0)),   # x tile
            smem, smem, smem, smem,                              # resident params
        ],
        out_specs=pl.BlockSpec((tbs, LANE), lambda i: (i, 0)),
        compiler_params=pltpu.CompilerParams(
            dimension_semantics=("parallel",),
        ),
    )(xf, w1f, b1f, w2f, b2f)

    # (n_rows, 128) slab -> (Bp, 1) -> drop padding rows.
    return out.reshape(Bp, 1)[:B]


def _reference(x, w1, b1, w2, b2):
    return jnp.maximum(x @ w1.T + b1, 0.0) @ w2.T + b2


if __name__ == "__main__":
    key = jax.random.PRNGKey(0)
    k_x, k_w1, k_b1, k_w2, k_b2, k_x2 = jax.random.split(key, 6)

    # Deterministic parameters (mimic nn.Linear uniform(-1/sqrt(fan_in), ...)).
    w1 = jax.random.uniform(k_w1, (8, 2), minval=-(2 ** -0.5), maxval=2 ** -0.5,
                            dtype=jnp.float32)
    b1 = jax.random.uniform(k_b1, (8,), minval=-(2 ** -0.5), maxval=2 ** -0.5,
                            dtype=jnp.float32)
    w2 = jax.random.uniform(k_w2, (1, 8), minval=-(8 ** -0.5), maxval=8 ** -0.5,
                            dtype=jnp.float32)
    b2 = jax.random.uniform(k_b2, (1,), minval=-(8 ** -0.5), maxval=8 ** -0.5,
                            dtype=jnp.float32)

    # Small-shape check (B = 8), single grid step.
    B = 8
    x = jax.random.normal(k_x, (B, 2), dtype=jnp.float32)
    out = my_neural_net(x, w1, b1, w2, b2)
    jax.block_until_ready(out)
    ref = _reference(x, w1, b1, w2, b2)
    assert out.shape == (B, 1)
    assert jnp.allclose(out, ref, atol=1e-5, rtol=1e-5), "mismatch vs reference (B=8)"

    # Multi-tile check: small block_rows forces a >1-step batch grid and
    # exercises padding of the last tile.
    B2 = 3000
    x2 = jax.random.normal(k_x2, (B2, 2), dtype=jnp.float32)
    out2 = my_neural_net(x2, w1, b1, w2, b2, block_rows=8)
    jax.block_until_ready(out2)
    ref2 = _reference(x2, w1, b1, w2, b2)
    assert out2.shape == (B2, 1)
    assert jnp.allclose(out2, ref2, atol=1e-5, rtol=1e-5), "mismatch vs reference (B=3000)"

    print("KERNEL_OK")
</pallas_src>

<mosaic_0001>
module attributes {stable_mosaic.version = 11 : i64} {
  func.func @mlp_kernel(%arg0: i32, %arg1: memref<2x8x128xf32, #tpu.memory_space<vmem>>, %arg2: memref<16xf32, #tpu.memory_space<smem>>, %arg3: memref<8xf32, #tpu.memory_space<smem>>, %arg4: memref<8xf32, #tpu.memory_space<smem>>, %arg5: memref<1xf32, #tpu.memory_space<smem>>, %arg6: memref<8x128xf32, #tpu.memory_space<vmem>>) attributes {dimension_semantics = [#tpu.dimension_semantics<parallel>], iteration_bounds = array<i64: 1>, scalar_prefetch = 0 : i64, scratch_operands = 0 : i64, tpu.core_type = #tpu.core_type<tc>, window_params = [{transform_indices = @transform_0, window_bounds = array<i64: 2, 8, 128>}, {transform_indices = @transform_1, window_bounds = array<i64: 16>}, {transform_indices = @transform_2, window_bounds = array<i64: 8>}, {transform_indices = @transform_3, window_bounds = array<i64: 8>}, {transform_indices = @transform_4, window_bounds = array<i64: 1>}, {transform_indices = @transform_5, window_bounds = array<i64: 8, 128>}]} {
    %c0 = arith.constant 0 : index
    %c0_0 = arith.constant 0 : index
    %c0_1 = arith.constant 0 : index
    %0 = vector.load %arg1[%c0, %c0_0, %c0_1] : memref<2x8x128xf32, #tpu.memory_space<vmem>>, vector<1x8x128xf32>
    %1 = vector.shape_cast %0 : vector<1x8x128xf32> to vector<8x128xf32>
    %c1 = arith.constant 1 : index
    %c0_2 = arith.constant 0 : index
    %c0_3 = arith.constant 0 : index
    %2 = vector.load %arg1[%c1, %c0_2, %c0_3] : memref<2x8x128xf32, #tpu.memory_space<vmem>>, vector<1x8x128xf32>
    %3 = vector.shape_cast %2 : vector<1x8x128xf32> to vector<8x128xf32>
    %cst = arith.constant 0.000000e+00 : f32
    %4 = vector.broadcast %cst : f32 to vector<8x128xf32>
    %c0_4 = arith.constant 0 : index
    %5 = memref.load %arg2[%c0_4] : memref<16xf32, #tpu.memory_space<smem>>
    %6 = vector.broadcast %5 : f32 to vector<8x128xf32>
    %7 = arith.mulf %6, %1 : vector<8x128xf32>
    %c1_5 = arith.constant 1 : index
    %8 = memref.load %arg2[%c1_5] : memref<16xf32, #tpu.memory_space<smem>>
    %9 = vector.broadcast %8 : f32 to vector<8x128xf32>
    %10 = arith.mulf %9, %3 : vector<8x128xf32>
    %11 = arith.addf %7, %10 : vector<8x128xf32>
    %c0_6 = arith.constant 0 : index
    %12 = memref.load %arg3[%c0_6] : memref<8xf32, #tpu.memory_space<smem>>
    %13 = vector.broadcast %12 : f32 to vector<8x128xf32>
    %14 = arith.addf %11, %13 : vector<8x128xf32>
    %cst_7 = arith.constant 0.000000e+00 : f32
    %15 = vector.broadcast %cst_7 : f32 to vector<8x128xf32>
    %16 = arith.maximumf %14, %15 : vector<8x128xf32>
    %c0_8 = arith.constant 0 : index
    %17 = memref.load %arg4[%c0_8] : memref<8xf32, #tpu.memory_space<smem>>
    %18 = vector.broadcast %17 : f32 to vector<8x128xf32>
    %19 = arith.mulf %18, %16 : vector<8x128xf32>
    %20 = arith.addf %4, %19 : vector<8x128xf32>
    %c2 = arith.constant 2 : index
    %21 = memref.load %arg2[%c2] : memref<16xf32, #tpu.memory_space<smem>>
    %22 = vector.broadcast %21 : f32 to vector<8x128xf32>
    %23 = arith.mulf %22, %1 : vector<8x128xf32>
    %c3 = arith.constant 3 : index
    %24 = memref.load %arg2[%c3] : memref<16xf32, #tpu.memory_space<smem>>
    %25 = vector.broadcast %24 : f32 to vector<8x128xf32>
    %26 = arith.mulf %25, %3 : vector<8x128xf32>
    %27 = arith.addf %23, %26 : vector<8x128xf32>
    %c1_9 = arith.constant 1 : index
    %28 = memref.load %arg3[%c1_9] : memref<8xf32, #tpu.memory_space<smem>>
    %29 = vector.broadcast %28 : f32 to vector<8x128xf32>
    %30 = arith.addf %27, %29 : vector<8x128xf32>
    %cst_10 = arith.constant 0.000000e+00 : f32
    %31 = vector.broadcast %cst_10 : f32 to vector<8x128xf32>
    %32 = arith.maximumf %30, %31 : vector<8x128xf32>
    %c1_11 = arith.constant 1 : index
    %33 = memref.load %arg4[%c1_11] : memref<8xf32, #tpu.memory_space<smem>>
    %34 = vector.broadcast %33 : f32 to vector<8x128xf32>
    %35 = arith.mulf %34, %32 : vector<8x128xf32>
    %36 = arith.addf %20, %35 : vector<8x128xf32>
    %c4 = arith.constant 4 : index
    %37 = memref.load %arg2[%c4] : memref<16xf32, #tpu.memory_space<smem>>
    %38 = vector.broadcast %37 : f32 to vector<8x128xf32>
    %39 = arith.mulf %38, %1 : vector<8x128xf32>
    %c5 = arith.constant 5 : index
    %40 = memref.load %arg2[%c5] : memref<16xf32, #tpu.memory_space<smem>>
    %41 = vector.broadcast %40 : f32 to vector<8x128xf32>
    %42 = arith.mulf %41, %3 : vector<8x128xf32>
    %43 = arith.addf %39, %42 : vector<8x128xf32>
    %c2_12 = arith.constant 2 : index
    %44 = memref.load %arg3[%c2_12] : memref<8xf32, #tpu.memory_space<smem>>
    %45 = vector.broadcast %44 : f32 to vector<8x128xf32>
    %46 = arith.addf %43, %45 : vector<8x128xf32>
    %cst_13 = arith.constant 0.000000e+00 : f32
    %47 = vector.broadcast %cst_13 : f32 to vector<8x128xf32>
    %48 = arith.maximumf %46, %47 : vector<8x128xf32>
    %c2_14 = arith.constant 2 : index
    %49 = memref.load %arg4[%c2_14] : memref<8xf32, #tpu.memory_space<smem>>
    %50 = vector.broadcast %49 : f32 to vector<8x128xf32>
    %51 = arith.mulf %50, %48 : vector<8x128xf32>
    %52 = arith.addf %36, %51 : vector<8x128xf32>
    %c6 = arith.constant 6 : index
    %53 = memref.load %arg2[%c6] : memref<16xf32, #tpu.memory_space<smem>>
    %54 = vector.broadcast %53 : f32 to vector<8x128xf32>
    %55 = arith.mulf %54, %1 : vector<8x128xf32>
    %c7 = arith.constant 7 : index
    %56 = memref.load %arg2[%c7] : memref<16xf32, #tpu.memory_space<smem>>
    %57 = vector.broadcast %56 : f32 to vector<8x128xf32>
    %58 = arith.mulf %57, %3 : vector<8x128xf32>
    %59 = arith.addf %55, %58 : vector<8x128xf32>
    %c3_15 = arith.constant 3 : index
    %60 = memref.load %arg3[%c3_15] : memref<8xf32, #tpu.memory_space<smem>>
    %61 = vector.broadcast %60 : f32 to vector<8x128xf32>
    %62 = arith.addf %59, %61 : vector<8x128xf32>
    %cst_16 = arith.constant 0.000000e+00 : f32
    %63 = vector.broadcast %cst_16 : f32 to vector<8x128xf32>
    %64 = arith.maximumf %62, %63 : vector<8x128xf32>
    %c3_17 = arith.constant 3 : index
    %65 = memref.load %arg4[%c3_17] : memref<8xf32, #tpu.memory_space<smem>>
    %66 = vector.broadcast %65 : f32 to vector<8x128xf32>
    %67 = arith.mulf %66, %64 : vector<8x128xf32>
    %68 = arith.addf %52, %67 : vector<8x128xf32>
    %c8 = arith.constant 8 : index
    %69 = memref.load %arg2[%c8] : memref<16xf32, #tpu.memory_space<smem>>
    %70 = vector.broadcast %69 : f32 to vector<8x128xf32>
    %71 = arith.mulf %70, %1 : vector<8x128xf32>
    %c9 = arith.constant 9 : index
    %72 = memref.load %arg2[%c9] : memref<16xf32, #tpu.memory_space<smem>>
    %73 = vector.broadcast %72 : f32 to vector<8x128xf32>
    %74 = arith.mulf %73, %3 : vector<8x128xf32>
    %75 = arith.addf %71, %74 : vector<8x128xf32>
    %c4_18 = arith.constant 4 : index
    %76 = memref.load %arg3[%c4_18] : memref<8xf32, #tpu.memory_space<smem>>
    %77 = vector.broadcast %76 : f32 to vector<8x128xf32>
    %78 = arith.addf %75, %77 : vector<8x128xf32>
    %cst_19 = arith.constant 0.000000e+00 : f32
    %79 = vector.broadcast %cst_19 : f32 to vector<8x128xf32>
    %80 = arith.maximumf %78, %79 : vector<8x128xf32>
    %c4_20 = arith.constant 4 : index
    %81 = memref.load %arg4[%c4_20] : memref<8xf32, #tpu.memory_space<smem>>
    %82 = vector.broadcast %81 : f32 to vector<8x128xf32>
    %83 = arith.mulf %82, %80 : vector<8x128xf32>
    %84 = arith.addf %68, %83 : vector<8x128xf32>
    %c10 = arith.constant 10 : index
    %85 = memref.load %arg2[%c10] : memref<16xf32, #tpu.memory_space<smem>>
    %86 = vector.broadcast %85 : f32 to vector<8x128xf32>
    %87 = arith.mulf %86, %1 : vector<8x128xf32>
    %c11 = arith.constant 11 : index
    %88 = memref.load %arg2[%c11] : memref<16xf32, #tpu.memory_space<smem>>
    %89 = vector.broadcast %88 : f32 to vector<8x128xf32>
    %90 = arith.mulf %89, %3 : vector<8x128xf32>
    %91 = arith.addf %87, %90 : vector<8x128xf32>
    %c5_21 = arith.constant 5 : index
    %92 = memref.load %arg3[%c5_21] : memref<8xf32, #tpu.memory_space<smem>>
    %93 = vector.broadcast %92 : f32 to vector<8x128xf32>
    %94 = arith.addf %91, %93 : vector<8x128xf32>
    %cst_22 = arith.constant 0.000000e+00 : f32
    %95 = vector.broadcast %cst_22 : f32 to vector<8x128xf32>
    %96 = arith.maximumf %94, %95 : vector<8x128xf32>
    %c5_23 = arith.constant 5 : index
    %97 = memref.load %arg4[%c5_23] : memref<8xf32, #tpu.memory_space<smem>>
    %98 = vector.broadcast %97 : f32 to vector<8x128xf32>
    %99 = arith.mulf %98, %96 : vector<8x128xf32>
    %100 = arith.addf %84, %99 : vector<8x128xf32>
    %c12 = arith.constant 12 : index
    %101 = memref.load %arg2[%c12] : memref<16xf32, #tpu.memory_space<smem>>
    %102 = vector.broadcast %101 : f32 to vector<8x128xf32>
    %103 = arith.mulf %102, %1 : vector<8x128xf32>
    %c13 = arith.constant 13 : index
    %104 = memref.load %arg2[%c13] : memref<16xf32, #tpu.memory_space<smem>>
    %105 = vector.broadcast %104 : f32 to vector<8x128xf32>
    %106 = arith.mulf %105, %3 : vector<8x128xf32>
    %107 = arith.addf %103, %106 : vector<8x128xf32>
    %c6_24 = arith.constant 6 : index
    %108 = memref.load %arg3[%c6_24] : memref<8xf32, #tpu.memory_space<smem>>
    %109 = vector.broadcast %108 : f32 to vector<8x128xf32>
    %110 = arith.addf %107, %109 : vector<8x128xf32>
    %cst_25 = arith.constant 0.000000e+00 : f32
    %111 = vector.broadcast %cst_25 : f32 to vector<8x128xf32>
    %112 = arith.maximumf %110, %111 : vector<8x128xf32>
    %c6_26 = arith.constant 6 : index
    %113 = memref.load %arg4[%c6_26] : memref<8xf32, #tpu.memory_space<smem>>
    %114 = vector.broadcast %113 : f32 to vector<8x128xf32>
    %115 = arith.mulf %114, %112 : vector<8x128xf32>
    %116 = arith.addf %100, %115 : vector<8x128xf32>
    %c14 = arith.constant 14 : index
    %117 = memref.load %arg2[%c14] : memref<16xf32, #tpu.memory_space<smem>>
    %118 = vector.broadcast %117 : f32 to vector<8x128xf32>
    %119 = arith.mulf %118, %1 : vector<8x128xf32>
    %c15 = arith.constant 15 : index
    %120 = memref.load %arg2[%c15] : memref<16xf32, #tpu.memory_space<smem>>
    %121 = vector.broadcast %120 : f32 to vector<8x128xf32>
    %122 = arith.mulf %121, %3 : vector<8x128xf32>
    %123 = arith.addf %119, %122 : vector<8x128xf32>
    %c7_27 = arith.constant 7 : index
    %124 = memref.load %arg3[%c7_27] : memref<8xf32, #tpu.memory_space<smem>>
    %125 = vector.broadcast %124 : f32 to vector<8x128xf32>
    %126 = arith.addf %123, %125 : vector<8x128xf32>
    %cst_28 = arith.constant 0.000000e+00 : f32
    %127 = vector.broadcast %cst_28 : f32 to vector<8x128xf32>
    %128 = arith.maximumf %126, %127 : vector<8x128xf32>
    %c7_29 = arith.constant 7 : index
    %129 = memref.load %arg4[%c7_29] : memref<8xf32, #tpu.memory_space<smem>>
    %130 = vector.broadcast %129 : f32 to vector<8x128xf32>
    %131 = arith.mulf %130, %128 : vector<8x128xf32>
    %132 = arith.addf %116, %131 : vector<8x128xf32>
    %c0_30 = arith.constant 0 : index
    %133 = memref.load %arg5[%c0_30] : memref<1xf32, #tpu.memory_space<smem>>
    %134 = vector.broadcast %133 : f32 to vector<8x128xf32>
    %135 = arith.addf %132, %134 : vector<8x128xf32>
    %c0_31 = arith.constant 0 : index
    %c0_32 = arith.constant 0 : index
    %136 = vector.load %arg6[%c0_31, %c0_32] : memref<8x128xf32, #tpu.memory_space<vmem>>, vector<8x128xf32>
    tpu.vector_store %arg6[%c0_31, %c0_32], %135 {strides = array<i32>} : memref<8x128xf32, #tpu.memory_space<vmem>>, vector<8x128xf32>,
    return
  }
  func.func @transform_0(%arg0: i32) -> (i32, i32, i32) {
    %c0_i32 = arith.constant 0 : i32
    %c0_i32_0 = arith.constant 0 : i32
    %c0_i32_1 = arith.constant 0 : i32
    return %c0_i32, %arg0, %c0_i32_0 : i32, i32, i32
  }
  func.func @transform_1(%arg0: i32) -> i32 {
    %c0_i32 = arith.constant 0 : i32
    %c0_i32_0 = arith.constant 0 : i32
    return %c0_i32 : i32
  }
  func.func @transform_2(%arg0: i32) -> i32 {
    %c0_i32 = arith.constant 0 : i32
    %c0_i32_0 = arith.constant 0 : i32
    return %c0_i32 : i32
  }
  func.func @transform_3(%arg0: i32) -> i32 {
    %c0_i32 = arith.constant 0 : i32
    %c0_i32_0 = arith.constant 0 : i32
    return %c0_i32 : i32
  }
  func.func @transform_4(%arg0: i32) -> i32 {
    %c0_i32 = arith.constant 0 : i32
    %c0_i32_0 = arith.constant 0 : i32
    return %c0_i32 : i32
  }
  func.func @transform_5(%arg0: i32) -> (i32, i32) {
    %c0_i32 = arith.constant 0 : i32
    %c0_i32_0 = arith.constant 0 : i32
    return %arg0, %c0_i32 : i32, i32
  }
}

</mosaic_0001>

<bundles_post_ra>
// kernel: tpu_custom_call.1
= control target key start
LH: loop header
LB: loop body
LE: loop exit
PB: predicated region body
PF: predicated region fallthrough
CT: control target
= control target key end

     0   :  { %11 = vsyncpa [#allocation4], 0  ;;  %s508_s0 = inlined_call_operand.hbm [shape: f32[2,8,128], index: 0, kind: input, shape index: {}]   ;;  %s509_s1 = inlined_call_operand.vmem [shape: f32[16], index: 1, kind: input, shape index: {}]   ;;  %s510_s2 = inlined_call_operand.vmem [shape: f32[8], index: 2, kind: input, shape index: {}]   ;;  %s511_s3 = inlined_call_operand.vmem [shape: f32[8], index: 3, kind: input, shape index: {}]   ;;  %s512_s4 = inlined_call_operand.<no memory space> [shape: f32[1], index: 4, kind: input, shape index: {}]   ;;  %s513_s5 = inlined_call_operand.hbm [shape: f32[8,128], index: 5, kind: output, shape index: {}]  }
   0x1   :  { %12 = vsyncpa [#allocation6], 0 }
   0x2   :  { %13 = vsyncpa [#allocation9], 0  ;;  %s43_s20 = sshll.u32 %s510_s2, 4  ;;  %s44_s20 = int_to_ptr.vmem [resolvable:$true] %s43_s20 }
   0x3   :  { %14 = vsyncpa [#allocation5], 0  ;;  %s252_s21 = scalar_lea.vmem %s44_s20, 16  ;;  %p257_p1 = scmp.lt.s32.totalorder %s44_s20, %s44_s20 }
   0x4   :  { %p253_p0 = scmp.ne.s32.totalorder %s44_s20, %s252_s21  ;;  %p258_p2 = scmp.lt.s32.totalorder %s252_s21, %s252_s21 }
   0x6   :  { %p259_p3 = por %p258_p2, %p257_p1 }
   0x8   :  { %p260_p4 = pnand %p259_p3, %p253_p0 }
   0xa   :  { %263 = shalt.err (!%p260_p4)
}
   0xb   :  { %s340_s22 = smov [#allocation8]   ;;  %s341_s23 = smov [#allocation3]  }
   0xc   :  { %46 = dma.vmem_to_smem %s44_s20, 16, %s340_s22, [#allocation9]  }
   0xd   :  { %s20_s24 = sshll.u32 %s341_s23, 4  ;;  %s264_s27 = scalar_lea.hbm %s508_s0, 256  ;;  %s21_s24 = int_to_ptr.vmem [resolvable:$true] %s20_s24 }
   0xe   :  { %p265_p5 = scmp.ne.s32.totalorder %s508_s0, %s264_s27  ;;  %p268_p6 = scmp.lt.u32.totalorder %s264_s27, %s508_s0 }
  0x10   :  { %p270_p7 = pnand %p268_p6, %p265_p5 }
  0x12   :  { %273 = shalt.err (!%p270_p7)
}
  0x13   :  { %s274_s6 = scalar_lea.vmem %s21_s24, 256  ;;  %p279_p9 = scmp.lt.s32.totalorder %s21_s24, %s21_s24 }
  0x14   :  { %p275_p8 = scmp.ne.s32.totalorder %s21_s24, %s274_s6  ;;  %p280_p10 = scmp.lt.s32.totalorder %s274_s6, %s274_s6 }
  0x16   :  { %p281_p11 = por %p280_p10, %p279_p9 }
  0x18   :  { %p282_p12 = pnand %p281_p11, %p275_p8 }
  0x1a   :  { %285 = shalt.err (!%p282_p12)
}
  0x1b   :  { %s342_s7 = smov 128   ;;  %s343_s8 = smov 8  }
  0x1c   :  { %26 = dma.hbm_to_vmem [thread:$0]  %s508_s0, 256, %s21_s24, [#allocation4], %s342_s7, %s342_s7, %s343_s8  }
  0x1d   :  { %s33_s13 = sshll.u32 %s509_s1, 4  ;;  %s53_s16 = sshll.u32 %s511_s3, 4  ;;  %s34_s13 = int_to_ptr.vmem [resolvable:$true] %s33_s13  ;;  %s54_s16 = int_to_ptr.vmem [resolvable:$true] %s53_s16 }
  0x1e   :  { %s286_s17 = scalar_lea.vmem %s34_s13, 16  ;;  %p291_p0 = scmp.lt.s32.totalorder %s34_s13, %s34_s13 }
  0x1f   :  { %p287_p13 = scmp.ne.s32.totalorder %s34_s13, %s286_s17  ;;  %p292_p1 = scmp.lt.s32.totalorder %s286_s17, %s286_s17 }
  0x21   :  { %p293_p2 = por %p292_p1, %p291_p0 }
  0x23   :  { %p294_p3 = pnand %p293_p2, %p287_p13 }
  0x25   :  { %297 = shalt.err (!%p294_p3)
}
  0x26   :  { %s344_s18 = smov [#allocation7]   ;;  %s298_s0 = scalar_lea.vmem %s54_s16, 16 }
  0x27   :  { %36 = dma.vmem_to_smem %s34_s13, 16, %s344_s18, [#allocation6]  }
  0x28   :  { %p299_p4 = scmp.ne.s32.totalorder %s54_s16, %s298_s0  ;;  %p303_p5 = scmp.lt.s32.totalorder %s54_s16, %s54_s16 }
  0x29   :  { %p304_p6 = scmp.lt.s32.totalorder %s298_s0, %s298_s0 }
  0x2b   :  { %p305_p7 = por %p304_p6, %p303_p5 }
  0x2d   :  { %p306_p8 = pnand %p305_p7, %p299_p4 }
  0x2f   :  { %309 = shalt.err (!%p306_p8)
}
  0x30   :  { %s345_s1 = smov [#allocation10]  }
  0x31   :  { %56 = dma.vmem_to_smem %s54_s16, 16, %s345_s1, [#allocation9]  }
  0x32   :  { %332 = dma.done.wait [#allocation4], 256  }
  0x33   :  { %333 = vsyncadd [#allocation4], 4294967040 }
  0x34   :  { %334 = dma.done.wait [#allocation6], 16  }
  0x35   :  { %335 = vsyncadd [#allocation6], 4294967280 }
  0x36   :  { %336 = dma.done.wait [#allocation9], 32  }
  0x37   :  { %337 = vsyncadd [#allocation9], 4294967264 }
  0x38   :  { %71 = sfence }
  0x39   :  { %s75_s3 = sld [smem:[#allocation7]]  ;;  %s216_s19 = sld [smem:[#allocation7 + $0x1]]  ;;  %v406_v0 = vld [vmem:[#allocation3] sm:$0xff]  ;;  %v408_v1 = vld [vmem:[#allocation3 + $0x8] sm:$0xff] }
  0x3a   :  { %s398_s20 = sld [smem:[#allocation8]]  ;;  %s217_s22 = sld [smem:[#allocation7 + $0x2]] }
  0x3b   :  { %s400_s21 = sld [smem:[#allocation10]]  ;;  %s218_s23 = sld [smem:[#allocation7 + $0x3]] }
  0x3c   :  { %s402_s24 = sld [smem:[#allocation8 + $0x1]]  ;;  %s221_s26 = sld [smem:[#allocation7 + $0x4]] }
  0x3d   :  { %s404_s25 = sld [smem:[#allocation10 + $0x1]]  ;;  %s222_s27 = sld [smem:[#allocation7 + $0x5]] }
  0x3e   :  { %s410_s28 = sld [smem:[#allocation8 + $0x2]]  ;;  %s414_s29 = sld [smem:[#allocation7 + $0x6]] }
  0x3f   :  { %s412_s2 = sld [smem:[#allocation10 + $0x2]]  ;;  %v76_v2 = vstv %s75_s3  ;;  %v79_v3 = vstv %s216_s19  ;;  %s416_s30 = sld [smem:[#allocation7 + $0x7]] }
  0x40   :  { %v77_v4 = vmul.f32 %v76_v2, %v406_v0  ;;  %v80_v5 = vmul.f32 %v79_v3, %v408_v1  ;;  %s420_s6 = sld [smem:[#allocation8 + $0x3]]  ;;  %v83_v6 = vstv %s398_s20  ;;  %v91_v7 = vstv %s217_s22  ;;  %s425_s8 = sld [smem:[#allocation7 + $0x8]] }
  0x41   :  { %s422_s7 = sld [smem:[#allocation10 + $0x3]]  ;;  %v94_v8 = vstv %s218_s23  ;;  %s427_s9 = sld [smem:[#allocation7 + $0x9]]  ;;  %v92_v10 = vmul.f32 %v91_v7, %v406_v0  ;;  %v87_v12 = vstv %s400_s21 }
  0x42   :  { %v81_v9 = vadd.f32 %v80_v5, %v77_v4  ;;  %v95_v11 = vmul.f32 %v94_v8, %v408_v1  ;;  %s431_s10 = sld [smem:[#allocation8 + $0x4]]  ;;  %v98_v13 = vstv %s402_s24  ;;  %v106_v14 = vstv %s221_s26  ;;  %s437_s12 = sld [smem:[#allocation7 + $0xa]] }
  0x43   :  { %s433_s11 = sld [smem:[#allocation10 + $0x4]]  ;;  %v109_v15 = vstv %s222_s27  ;;  %s439_s13 = sld [smem:[#allocation7 + $0xb]]  ;;  %v107_v18 = vmul.f32 %v106_v14, %v406_v0  ;;  %v102_v20 = vstv %s404_s25 }
  0x44   :  { %v84_v16 = vadd.f32 %v83_v6, %v81_v9  ;;  %v96_v17 = vadd.f32 %v95_v11, %v92_v10  ;;  %v110_v19 = vmul.f32 %v109_v15, %v408_v1  ;;  %s443_s14 = sld [smem:[#allocation8 + $0x5]]  ;;  %v113_v21 = vstv %s410_s28  ;;  %s449_s15 = sld [smem:[#allocation7 + $0xc]] }
  0x45   :  { %v121_v22 = vstv %s414_s29  ;;  %v124_v23 = vstv %s416_s30  ;;  %s451_s16 = sld [smem:[#allocation7 + $0xd]]  ;;  %v117_v28 = vstv %s412_s2  ;;  %s460_s18 = sld [smem:[#allocation8 + $0x6]] }
  0x46   :  { %v85_v24 = vmax.f32 %v84_v16, 0.0  ;;  %v99_v25 = vadd.f32 %v98_v13, %v96_v17  ;;  %v111_v26 = vadd.f32 %v110_v19, %v107_v18  ;;  %v122_v27 = vmul.f32 %v121_v22, %v406_v0  ;;  %s458_s17 = sld [smem:[#allocation10 + $0x5]]  ;;  %s463_s0 = sld [smem:[#allocation7 + $0xe]] }
  0x47   :  { %v125_v29 = vmul.f32 %v124_v23, %v408_v1  ;;  %v128_v30 = vstv %s420_s6  ;;  %v136_v31 = vstv %s425_s8  ;;  %s465_s1 = sld [smem:[#allocation7 + $0xf]]  ;;  %v132_v37 = vstv %s422_s7  ;;  %s478_s19 = sld [smem:[#allocation10 + $0x6]] }
  0x48   :  { %v88_v32 = vmul.f32 %v87_v12, %v85_v24  ;;  %v100_v33 = vmax.f32 %v99_v25, 0.0  ;;  %v114_v34 = vadd.f32 %v113_v21, %v111_v26  ;;  %v137_v35 = vmul.f32 %v136_v31, %v406_v0  ;;  %s472_s3 = sld [smem:[#allocation8 + $0x7]]  ;;  %s346_s23 = smov [#allocation11]  }
  0x49   :  { %v126_v36 = vadd.f32 %v125_v29, %v122_v27  ;;  %v139_v38 = vstv %s427_s9  ;;  %v143_v39 = vstv %s431_s10  ;;  %v151_v43 = vstv %s437_s12  ;;  %s244_s20 = sld [smem:[#allocation10 + $0x7]]  ;;  %s205_s24 = sshll.u32 %s346_s23, 4  ;;  %s206_s24 = int_to_ptr.vmem [resolvable:$true] %s205_s24 }
  0x4a   :  { %v103_v40 = vmul.f32 %v102_v20, %v100_v33  ;;  %v115_v41 = vmax.f32 %v114_v34, 0.0  ;;  %v140_v42 = vmul.f32 %v139_v38, %v408_v1  ;;  %v147_v45 = vstv %s433_s11  ;;  %s310_s25 = scalar_lea.vmem %s206_s24, 128  ;;  %p315_p10 = scmp.lt.s32.totalorder %s206_s24, %s206_s24 }
  0x4b   :  { %v129_v44 = vadd.f32 %v128_v30, %v126_v36  ;;  %v152_v46 = vmul.f32 %v151_v43, %v406_v0  ;;  %v154_v47 = vstv %s439_s13  ;;  %v158_v53 = vstv %s443_s14  ;;  %p311_p9 = scmp.ne.s32.totalorder %s206_s24, %s310_s25  ;;  %p316_p11 = scmp.lt.s32.totalorder %s310_s25, %s310_s25 }
  0x4c   :  { %v104_v48 = vadd.f32 %v103_v40, %v88_v32  ;;  %v118_v49 = vmul.f32 %v117_v28, %v115_v41  ;;  %v141_v50 = vadd.f32 %v140_v42, %v137_v35  ;;  %v155_v51 = vmul.f32 %v154_v47, %v408_v1 }
  0x4d   :  { %v130_v52 = vmax.f32 %v129_v44, 0.0  ;;  %v166_v54 = vstv %s449_s15  ;;  %v169_v55 = vstv %s451_s16  ;;  %v162_v61 = vstv %s458_s17  ;;  %p317_p12 = por %p316_p11, %p315_p10 }
  0x4e   :  { %v119_v56 = vadd.f32 %v118_v49, %v104_v48  ;;  %v144_v57 = vadd.f32 %v143_v39, %v141_v50  ;;  %v156_v58 = vadd.f32 %v155_v51, %v152_v46  ;;  %v167_v59 = vmul.f32 %v166_v54, %v406_v0 }
  0x4f   :  { %v133_v60 = vmul.f32 %v132_v37, %v130_v52  ;;  %v170_v62 = vmul.f32 %v169_v55, %v408_v1  ;;  %v173_v63 = vstv %s460_s18  ;;  %v181_v4 = vstv %s463_s0  ;;  %p318_p13 = pnand %p317_p12, %p311_p9 }
  0x50   :  { %v145_v2 = vmax.f32 %v144_v57, 0.0  ;;  %v159_v3 = vadd.f32 %v158_v53, %v156_v58  ;;  %v184_v5 = vstv %s465_s1  ;;  %v182_v8 = vmul.f32 %v181_v4, %v406_v0 }
  0x51   :  { %v134_v6 = vadd.f32 %v133_v60, %v119_v56  ;;  %v171_v7 = vadd.f32 %v170_v62, %v167_v59  ;;  %v185_v9 = vmul.f32 %v184_v5, %v408_v1  ;;  %v188_v12 = vstv %s472_s3 }
  0x52   :  { %v148_v10 = vmul.f32 %v147_v45, %v145_v2  ;;  %v160_v11 = vmax.f32 %v159_v3, 0.0  ;;  %v177_v17 = vstv %s478_s19  ;;  %v192_v21 = vstv %s244_s20 }
  0x53   :  { %v174_v13 = vadd.f32 %v173_v63, %v171_v7  ;;  %v186_v14 = vadd.f32 %v185_v9, %v182_v8  ;;  %v196_v0 = vstv %s512_s4 }
  0x54   :  { %v149_v15 = vadd.f32 %v148_v10, %v134_v6  ;;  %v163_v16 = vmul.f32 %v162_v61, %v160_v11 }
  0x55   :  { %v175_v18 = vmax.f32 %v174_v13, 0.0  ;;  %v189_v19 = vadd.f32 %v188_v12, %v186_v14 }
  0x56   :  { %v164_v20 = vadd.f32 %v163_v16, %v149_v15 }
  0x57   :  { %v178_v22 = vmul.f32 %v177_v17, %v175_v18  ;;  %v190_v23 = vmax.f32 %v189_v19, 0.0 }
  0x59   :  { %v179_v24 = vadd.f32 %v178_v22, %v164_v20  ;;  %v193_v25 = vmul.f32 %v192_v21, %v190_v23 }
  0x5b   :  { %v194_v1 = vadd.f32 %v193_v25, %v179_v24 }
  0x5d   :  { %v197_v26 = vadd.f32 %v196_v0, %v194_v1 }
  0x5f   :  { %198 = vst [vmem:[#allocation11] sm:$0xff] %v197_v26 }
  0x60   :  { %321 = shalt.err (!%p318_p13)
}
  0x61   :  { %s322_s28 = scalar_lea.hbm %s513_s5, 128 }
  0x62   :  { %p323_p0 = scmp.ne.s32.totalorder %s513_s5, %s322_s28  ;;  %p326_p1 = scmp.lt.u32.totalorder %s322_s28, %s513_s5 }
  0x64   :  { %p328_p2 = pnand %p326_p1, %p323_p0 }
  0x66   :  { %331 = shalt.err (!%p328_p2)
}
  0x67   :  { %208 = dma.vmem_to_hbm [thread:$0]  %s206_s24, 128, %s513_s5, [#allocation5]  }
  0x68   :  { %338 = dma.done.wait [#allocation5], 128  }
  0x69   :  { %339 = vsyncadd [#allocation5], 4294967168 }
  0x6a   :  { %212 = vsyncpa [#allocation4], 1 }
  0x6b   :  { %213 = vsyncpa [#allocation5], 1 }
  0x6c   :  { %214 = vsyncpa [#allocation6], 1 }
  0x6d   :  { %215 = vsyncpa [#allocation9], 1 }

</bundles_post_ra>
